<compile_context>
chip_gen: v7x
topology: tpu7x:2x2x1
jax: 0.10.0
libtpu: 0.0.40
codegen_flags: <defaults>
</compile_context>

<pallas_src>
import jax
import jax.numpy as jnp
from jax.experimental import pallas as pl
from jax.experimental.pallas import tpu as pltpu

INPUT_SIZE = 10
LAYER_SIZE = 15
OUTPUT_SIZE = 5
NUM_SAMPLES = 20


def mlp_kernel(x_ref, w1_ref, b1_ref, w2_ref, b2_ref, o_ref):
    # x_ref: (rows, 10); w1_ref: (10, 15); b1_ref: (1, 15)
    # w2_ref: (15, 5);  b2_ref: (1, 5);   o_ref: (rows, 5)
    x = x_ref[...]
    h = jnp.dot(x, w1_ref[...], preferred_element_type=jnp.float32)   # (rows, 15)
    h = jnp.maximum(h + b1_ref[...], 0.0)                              # bias + ReLU
    y = jnp.dot(h, w2_ref[...], preferred_element_type=jnp.float32)   # (rows, 5)
    o_ref[...] = (y + b2_ref[...]).astype(o_ref.dtype)


def neural_network_forward(x, w1, b1, w2, b2, *, tile_n=512):
    """Forward pass identical to the PyTorch module: layer2(relu(layer1(x))).

    x:  (N, 10) f32
    w1: (15, 10), b1: (15,)   -- native PyTorch (out, in)/(out,) layout
    w2: (5, 15),  b2: (5,)
    Returns (N, 5) f32.
    """
    n = x.shape[0]
    # One-time layout prep (fused by XLA into the call site; tiny tensors):
    w1_t = jnp.transpose(w1)                      # (10, 15)  NN-form RHS
    w2_t = jnp.transpose(w2)                      # (15, 5)
    b1_2d = jnp.reshape(b1, (1, LAYER_SIZE))      # broadcastable on VPU
    b2_2d = jnp.reshape(b2, (1, OUTPUT_SIZE))

    use_tiled = (n % tile_n == 0) and (n // tile_n >= 2)

    if not use_tiled:
        # Single grid step, full-array blocks (exempt from (8,128) divisibility).
        return pl.pallas_call(
            mlp_kernel,
            out_shape=jax.ShapeDtypeStruct((n, OUTPUT_SIZE), jnp.float32),
            grid=(1,),
            in_specs=[
                pl.BlockSpec((n, INPUT_SIZE), lambda i: (0, 0)),
                pl.BlockSpec((INPUT_SIZE, LAYER_SIZE), lambda i: (0, 0)),
                pl.BlockSpec((1, LAYER_SIZE), lambda i: (0, 0)),
                pl.BlockSpec((LAYER_SIZE, OUTPUT_SIZE), lambda i: (0, 0)),
                pl.BlockSpec((1, OUTPUT_SIZE), lambda i: (0, 0)),
            ],
            out_specs=pl.BlockSpec((n, OUTPUT_SIZE), lambda i: (0, 0)),
            compiler_params=pltpu.CompilerParams(
                dimension_semantics=("arbitrary",)),
        )(x, w1_t, b1_2d, w2_t, b2_2d)

    # Large-batch path: row-tiled, weights/biases stay VMEM-resident
    # (constant index_map -> revisit DMA skipped); "parallel" lets the grid
    # shard across TensorCores on v7x.
    grid = (n // tile_n,)
    return pl.pallas_call(
        mlp_kernel,
        out_shape=jax.ShapeDtypeStruct((n, OUTPUT_SIZE), jnp.float32),
        grid=grid,
        in_specs=[
            pl.BlockSpec((tile_n, INPUT_SIZE), lambda i: (i, 0)),
            pl.BlockSpec((INPUT_SIZE, LAYER_SIZE), lambda i: (0, 0)),
            pl.BlockSpec((1, LAYER_SIZE), lambda i: (0, 0)),
            pl.BlockSpec((LAYER_SIZE, OUTPUT_SIZE), lambda i: (0, 0)),
            pl.BlockSpec((1, OUTPUT_SIZE), lambda i: (0, 0)),
        ],
        out_specs=pl.BlockSpec((tile_n, OUTPUT_SIZE), lambda i: (i, 0)),
        compiler_params=pltpu.CompilerParams(
            dimension_semantics=("parallel",)),
    )(x, w1_t, b1_2d, w2_t, b2_2d)


def init_params(key):
    """Deterministic init mimicking nn.Linear's U(-1/sqrt(fan_in), 1/sqrt(fan_in))."""
    k1, k2, k3, k4 = jax.random.split(key, 4)
    lim1 = 1.0 / (INPUT_SIZE ** 0.5)
    lim2 = 1.0 / (LAYER_SIZE ** 0.5)
    w1 = jax.random.uniform(k1, (LAYER_SIZE, INPUT_SIZE), jnp.float32, -lim1, lim1)
    b1 = jax.random.uniform(k2, (LAYER_SIZE,), jnp.float32, -lim1, lim1)
    w2 = jax.random.uniform(k3, (OUTPUT_SIZE, LAYER_SIZE), jnp.float32, -lim2, lim2)
    b2 = jax.random.uniform(k4, (OUTPUT_SIZE,), jnp.float32, -lim2, lim2)
    return w1, b1, w2, b2


if __name__ == "__main__":
    key = jax.random.PRNGKey(0)
    k_x, k_p = jax.random.split(key)
    x = jax.random.normal(k_x, (NUM_SAMPLES, INPUT_SIZE), jnp.float32)
    w1, b1, w2, b2 = init_params(k_p)

    out = neural_network_forward(x, w1, b1, w2, b2)
    out = jax.block_until_ready(out)

    # Pure-JAX reference (same math as the PyTorch module).
    ref = jnp.maximum(x @ w1.T + b1, 0.0) @ w2.T + b2
    assert out.shape == (NUM_SAMPLES, OUTPUT_SIZE)
    assert jnp.allclose(out, ref, atol=1e-5, rtol=1e-5)

    print("KERNEL_OK")
</pallas_src>

<mosaic_0001>
module attributes {stable_mosaic.version = 11 : i64} {
  func.func @mlp_kernel(%arg0: i32, %arg1: memref<20x10xf32, #tpu.memory_space<vmem>>, %arg2: memref<10x15xf32, #tpu.memory_space<vmem>>, %arg3: memref<1x15xf32, #tpu.memory_space<vmem>>, %arg4: memref<15x5xf32, #tpu.memory_space<vmem>>, %arg5: memref<1x5xf32, #tpu.memory_space<vmem>>, %arg6: memref<20x5xf32, #tpu.memory_space<vmem>>) attributes {dimension_semantics = [#tpu.dimension_semantics<arbitrary>], iteration_bounds = array<i64: 1>, scalar_prefetch = 0 : i64, scratch_operands = 0 : i64, tpu.core_type = #tpu.core_type<tc>, window_params = [{pipeline_mode = #tpu.pipeline_mode<synchronous>, transform_indices = @transform_0, window_bounds = array<i64: 20, 10>}, {pipeline_mode = #tpu.pipeline_mode<synchronous>, transform_indices = @transform_1, window_bounds = array<i64: 10, 15>}, {pipeline_mode = #tpu.pipeline_mode<synchronous>, transform_indices = @transform_2, window_bounds = array<i64: 1, 15>}, {pipeline_mode = #tpu.pipeline_mode<synchronous>, transform_indices = @transform_3, window_bounds = array<i64: 15, 5>}, {pipeline_mode = #tpu.pipeline_mode<synchronous>, transform_indices = @transform_4, window_bounds = array<i64: 1, 5>}, {pipeline_mode = #tpu.pipeline_mode<synchronous>, transform_indices = @transform_5, window_bounds = array<i64: 20, 5>}]} {
    %c0 = arith.constant 0 : index
    %c0_0 = arith.constant 0 : index
    %0 = vector.load %arg1[%c0, %c0_0] : memref<20x10xf32, #tpu.memory_space<vmem>>, vector<20x10xf32>
    %c0_1 = arith.constant 0 : index
    %c0_2 = arith.constant 0 : index
    %1 = vector.load %arg2[%c0_1, %c0_2] : memref<10x15xf32, #tpu.memory_space<vmem>>, vector<10x15xf32>
    %cst = arith.constant dense<0.000000e+00> : vector<20x15xf32>
    %2 = tpu.matmul %0, %1, %cst {dimension_numbers = #tpu.dot_dimension_numbers<[1], [0], [0], [1], [0, 0, 1, 1], [], []>} : vector<20x10xf32>, vector<10x15xf32>, vector<20x15xf32> -> vector<20x15xf32>
    %c0_3 = arith.constant 0 : index
    %c0_4 = arith.constant 0 : index
    %3 = vector.load %arg3[%c0_3, %c0_4] : memref<1x15xf32, #tpu.memory_space<vmem>>, vector<1x15xf32>
    %4 = vector.broadcast %3 : vector<1x15xf32> to vector<20x15xf32>
    %5 = arith.addf %2, %4 : vector<20x15xf32>
    %cst_5 = arith.constant 0.000000e+00 : f32
    %6 = vector.broadcast %cst_5 : f32 to vector<20x15xf32>
    %7 = arith.maximumf %5, %6 : vector<20x15xf32>
    %c0_6 = arith.constant 0 : index
    %c0_7 = arith.constant 0 : index
    %8 = vector.load %arg4[%c0_6, %c0_7] : memref<15x5xf32, #tpu.memory_space<vmem>>, vector<15x5xf32>
    %cst_8 = arith.constant dense<0.000000e+00> : vector<20x5xf32>
    %9 = tpu.matmul %7, %8, %cst_8 {dimension_numbers = #tpu.dot_dimension_numbers<[1], [0], [0], [1], [0, 0, 1, 1], [], []>} : vector<20x15xf32>, vector<15x5xf32>, vector<20x5xf32> -> vector<20x5xf32>
    %c0_9 = arith.constant 0 : index
    %c0_10 = arith.constant 0 : index
    %10 = vector.load %arg5[%c0_9, %c0_10] : memref<1x5xf32, #tpu.memory_space<vmem>>, vector<1x5xf32>
    %11 = vector.broadcast %10 : vector<1x5xf32> to vector<20x5xf32>
    %12 = arith.addf %9, %11 : vector<20x5xf32>
    %c0_11 = arith.constant 0 : index
    %c0_12 = arith.constant 0 : index
    %13 = vector.load %arg6[%c0_11, %c0_12] : memref<20x5xf32, #tpu.memory_space<vmem>>, vector<20x5xf32>
    tpu.vector_store %arg6[%c0_11, %c0_12], %12 {strides = array<i32>} : memref<20x5xf32, #tpu.memory_space<vmem>>, vector<20x5xf32>,
    return
  }
  func.func @transform_0(%arg0: i32) -> (i32, i32) {
    %c0_i32 = arith.constant 0 : i32
    %c0_i32_0 = arith.constant 0 : i32
    %c0_i32_1 = arith.constant 0 : i32
    return %c0_i32, %c0_i32_0 : i32, i32
  }
  func.func @transform_1(%arg0: i32) -> (i32, i32) {
    %c0_i32 = arith.constant 0 : i32
    %c0_i32_0 = arith.constant 0 : i32
    %c0_i32_1 = arith.constant 0 : i32
    return %c0_i32, %c0_i32_0 : i32, i32
  }
  func.func @transform_2(%arg0: i32) -> (i32, i32) {
    %c0_i32 = arith.constant 0 : i32
    %c0_i32_0 = arith.constant 0 : i32
    %c0_i32_1 = arith.constant 0 : i32
    return %c0_i32, %c0_i32_0 : i32, i32
  }
  func.func @transform_3(%arg0: i32) -> (i32, i32) {
    %c0_i32 = arith.constant 0 : i32
    %c0_i32_0 = arith.constant 0 : i32
    %c0_i32_1 = arith.constant 0 : i32
    return %c0_i32, %c0_i32_0 : i32, i32
  }
  func.func @transform_4(%arg0: i32) -> (i32, i32) {
    %c0_i32 = arith.constant 0 : i32
    %c0_i32_0 = arith.constant 0 : i32
    %c0_i32_1 = arith.constant 0 : i32
    return %c0_i32, %c0_i32_0 : i32, i32
  }
  func.func @transform_5(%arg0: i32) -> (i32, i32) {
    %c0_i32 = arith.constant 0 : i32
    %c0_i32_0 = arith.constant 0 : i32
    %c0_i32_1 = arith.constant 0 : i32
    return %c0_i32, %c0_i32_0 : i32, i32
  }
}

</mosaic_0001>

<bundles_post_ra>
// kernel: tpu_custom_call.1
= control target key start
LH: loop header
LB: loop body
LE: loop exit
PB: predicated region body
PF: predicated region fallthrough
CT: control target
= control target key end

     0   :  { %vm42_vm0 = vcmask 1041408   ;;  %v299_v0 = vmov 0.0|0.0   ;;  %vm300_vm1 = vmmov 1   ;;  %vm301_vm3 = vmmov 0   ;;  %s377_s1 = inlined_call_operand.vmem [shape: f32[10,15], index: 1, kind: input, shape index: {}]   ;;  %s378_s0 = inlined_call_operand.vmem [shape: f32[20,10], index: 0, kind: input, shape index: {}]   ;;  %s379_s3 = inlined_call_operand.vmem [shape: f32[15,5], index: 3, kind: input, shape index: {}]   ;;  %s380_s2 = inlined_call_operand.vmem [shape: f32[1,15], index: 2, kind: input, shape index: {}]   ;;  %s381_s4 = inlined_call_operand.vmem [shape: f32[1,5], index: 4, kind: input, shape index: {}]   ;;  %s382_s5 = inlined_call_operand.vmem [shape: f32[20,5], index: 5, kind: output, shape index: {}]  }
   0x1   :  { %287 = vmatprep.subr.bf16.mxu0 %v299_v0  ;;  %v23_v1 = vld [vmem:[%s377_s1] sm:$0xff]  ;;  %v24_v2 = vld [vmem:[%s377_s1 + $0x8] sm:$0x3]  ;;  %vm289_vm2 = vmpackc.low %vm42_vm0, %vm300_vm1  ;;  %291 = vmatprep.subr.bf16.mxu1 %v299_v0  ;;  %v302_v4 = vmov 0.0   ;;  %vm32_vm4 = vcmask 80896   ;;  %vm148_vm5 = vcmask 1046528  }
   0x2   :  { %v288_v3 = vpack.c.bf16 %v24_v2, %v23_v1  ;;  %265 = vmatprep.mubr.msk.f32.mxu0 %vm301_vm3, %v302_v4  ;;  %278 = vmatprep.mubr.msk.f32.mxu1 %vm301_vm3, %v302_v4  ;;  %v20_v5 = vld [vmem:[%s378_s0] sm:$0xff]  ;;  %v21_v6 = vld [vmem:[%s378_s0 + $0x8] sm:$0xff]  ;;  %v22_v7 = vld [vmem:[%s378_s0 + $0x10] sm:$0xf]  ;;  %vm138_vm7 = vcmask 121856   ;;  %vm232_vm8 = vcmask 39936  }
   0x3   :  { %v129_v8 = vld [vmem:[%s379_s3] sm:$0xff]  ;;  %v130_v9 = vld [vmem:[%s379_s3 + $0x8] sm:$0x7f]  ;;  %vm293_vm6 = vmpackc.low %vm148_vm5, %vm300_vm1  ;;  %vm235_vm9 = vcmask 35840  }
   0x4   :  { %290 = vmatpush3.bf16.msk.msra.mxu0 %vm289_vm2, %v288_v3  ;;  %v292_v10 = vpack.c.bf16 %v130_v9, %v129_v8  ;;  %v241_v11 = vld [vmem:[%s380_s2] ss:$0 sm:$0xff] }
   0x5   :  { %v246_v24 = vld [vmem:[%s381_s4] ss:$0 sm:$0xff] }
   0x6   :  { %294 = vmatpush3.bf16.msk.msra.mxu1 %vm293_vm6, %v292_v10 }
   0x7   :  { %266 = vmatmul.mubr.msk.f32.vlgmr.msra.gmra.mrb[0].mxu0 %vm32_vm4, %v20_v5 }
   0x8   :  { %268 = vmatprep.mubr.msk.f32.mxu0 %vm301_vm3, %v302_v4 }
   0xb   :  { %269 = vmatmul.mubr.msk.f32.gmra.mrb[2].mxu0 %vm32_vm4, %v21_v6 }
   0xc   :  { %271 = vmatprep.mubr.msk.f32.mxu0 %vm301_vm3, %v302_v4 }
   0xf   :  { %272 = vmatmul.mubr.msk.f32.gmra.mrb[4].mxu0 %vm32_vm4, %v22_v7 }
  0xda   :  { %v112_v12 = vpop.f32.mrb[0].mxu0 }
  0xdb   :  { %v113_v13 = vadd.f32 %v241_v11, %v112_v12  ;;  %v267_v14 = vpop.f32.mrb[1].mxu0 }
  0xdd   :  { %v126_v15 = vmax.f32 %v113_v13, 0.0 }
  0xde   :  { %v117_v16 = vpop.f32.mrb[2].mxu0 }
  0xdf   :  { %v118_v17 = vadd.f32 %v241_v11, %v117_v16  ;;  %v270_v18 = vpop.f32.mrb[3].mxu0  ;;  %279 = vmatmul.mubr.msk.f32.vlgmr.msra.gmra.mrb[0].mxu1 %vm138_vm7, %v126_v15 }
  0xe0   :  { %281 = vmatprep.mubr.msk.f32.mxu1 %vm301_vm3, %v302_v4 }
  0xe1   :  { %v127_v19 = vmax.f32 %v118_v17, 0.0 }
  0xe2   :  { %v122_v20 = vpop.f32.mrb[4].mxu0 }
  0xe3   :  { %v123_v21 = vadd.f32 %v241_v11, %v122_v20  ;;  %v273_v22 = vpop.f32.mrb[5].mxu0  ;;  %282 = vmatmul.mubr.msk.f32.gmra.mrb[2].mxu1 %vm138_vm7, %v127_v19 }
  0xe4   :  { %284 = vmatprep.mubr.msk.f32.mxu1 %vm301_vm3, %v302_v4 }
  0xe5   :  { %v128_v23 = vmax.f32 %v123_v21, 0.0 }
  0xe7   :  { %285 = vmatmul.mubr.msk.f32.gmra.mrb[4].mxu1 %vm138_vm7, %v128_v23 }
 0x1b2   :  { %v218_v25 = vpop.f32.mrb[0].mxu1 }
 0x1b3   :  { %v219_v26 = vadd.f32 %v246_v24, %v218_v25  ;;  %v280_v27 = vpop.f32.mrb[1].mxu1 }
 0x1b5   :  { %233 = vst.msk [vmem:[%s382_s5] sm:$0xff] %vm232_vm8, %v219_v26 }
 0x1b6   :  { %v223_v28 = vpop.f32.mrb[2].mxu1 }
 0x1b7   :  { %v224_v29 = vadd.f32 %v246_v24, %v223_v28  ;;  %v283_v30 = vpop.f32.mrb[3].mxu1 }
 0x1b9   :  { %234 = vst.msk [vmem:[%s382_s5 + $0x8] sm:$0xff] %vm232_vm8, %v224_v29 }
 0x1ba   :  { %v228_v31 = vpop.f32.mrb[4].mxu1 }
 0x1bb   :  { %v229_v32 = vadd.f32 %v246_v24, %v228_v31  ;;  %v286_v33 = vpop.f32.mrb[5].mxu1 }
 0x1bd   :  { %236 = vst.msk [vmem:[%s382_s5 + $0x10] sm:$0xf] %vm235_vm9, %v229_v32 }

</bundles_post_ra>
